<compile_context>
chip_gen: v7x
topology: tpu7x:2x2x1
jax: 0.10.0
libtpu: 0.0.40
codegen_flags: <defaults>
</compile_context>

<pallas_src>
import jax
import jax.numpy as jnp
from jax.experimental import pallas as pl
from jax.experimental.pallas import tpu as pltpu


def attention_mlp_kernel(x_ref, wv_ref, bv_ref, w1_ref, b1_ref,
                         w2_ref, b2_ref, w3_ref, b3_ref, o_ref):
    # seq_len == 1 => softmax(q k^T / sqrt(A)) == 1.0 exactly, so the
    # attention block reduces to the value projection (q/k are dead).
    x = x_ref[...].astype(jnp.bfloat16)               # in-kernel cast (VPU)

    v = jnp.dot(x, wv_ref[...],
                preferred_element_type=jnp.float32) + bv_ref[...]

    h1 = jnp.dot(v.astype(jnp.bfloat16), w1_ref[...],
                 preferred_element_type=jnp.float32) + b1_ref[...]
    h1 = jnp.maximum(h1, 0.0)
    # TODO(synk): nn.Dropout(0.3) is identity at inference; training-mode
    # dropout would use pltpu.prng_seed / pltpu.prng_random_bits.

    h2 = jnp.dot(h1.astype(jnp.bfloat16), w2_ref[...],
                 preferred_element_type=jnp.float32) + b2_ref[...]
    h2 = jnp.maximum(h2, 0.0)

    out = jnp.dot(h2.astype(jnp.bfloat16), w3_ref[...],
                  preferred_element_type=jnp.float32) + b3_ref[...]
    o_ref[...] = out.astype(o_ref.dtype)


def attention_mlp(x, wq, bq, wk, bk, wv, bv, w1, b1, w2, b2, w3, b3,
                  *, block_b=2048):
    B, D_in = x.shape
    A = wv.shape[1]
    H = w1.shape[1]
    F2 = w2.shape[1]
    F3 = w3.shape[1]

    # seq_len == 1: attention output == value projection. The q/k parameters
    # are mathematically dead in this forward pass.
    del wq, bq, wk, bk

    # bf16 MXU operands (weights cast once here -> half the weight DMA bytes);
    # biases stay f32 (added after f32 accumulation).
    wv_bf = wv.astype(jnp.bfloat16)
    w1_bf = w1.astype(jnp.bfloat16)
    w2_bf = w2.astype(jnp.bfloat16)
    w3_bf = w3.astype(jnp.bfloat16)

    weights = (wv_bf, bv, w1_bf, b1, w2_bf, b2, w3_bf, b3)
    weight_bytes = sum(int(a.size) * a.dtype.itemsize for a in weights)

    # Per-row VMEM footprint estimate: f32 x tile (double-buffered) + its bf16
    # copy + f32/bf16 intermediates (v, h1, h2) + f32 output (double-buffered).
    per_row = 8 * D_in + 2 * D_in + 6 * (A + H + F2) + 8 * F3
    vmem_budget = 24 << 20                     # fits v5e/v6e/v7x with headroom
    tb_cap = max(8, ((vmem_budget - 2 * weight_bytes) // max(per_row, 1)) // 8 * 8)

    def round_up(v, m):
        return ((v + m - 1) // m) * m

    if B <= 16:
        # Tiny batch: a single tile equal to the full batch dim (legal via the
        # "block equals full array dim" exemption, no padding needed).
        tb = B
    else:
        # Amortize per-step overhead with a big tile, but keep >= 2 tiles so
        # v7x's second TensorCore gets work, and respect the VMEM cap.
        tb = min(block_b, tb_cap, round_up(pl.cdiv(B, 2), 8))
        tb = max(8, (tb // 8) * 8)
    n_tiles = pl.cdiv(B, tb)
    Bp = n_tiles * tb

    xp = x if Bp == B else jnp.pad(x, ((0, Bp - B), (0, 0)))

    # Constant index_map -> Mosaic keeps weight/bias blocks resident across
    # grid steps (no re-DMA per batch tile).
    def full(arr):
        return pl.BlockSpec(arr.shape, lambda i: (0,) * arr.ndim)

    flops = 2 * Bp * (D_in * A + A * H + H * F2 + F2 * F3)
    bytes_accessed = (int(xp.size) * xp.dtype.itemsize
                      + weight_bytes
                      + Bp * F3 * 4)

    vmem_limit = 32 << 20   # covers the 24 MiB budget with headroom on all gens

    out = pl.pallas_call(
        attention_mlp_kernel,
        out_shape=jax.ShapeDtypeStruct((Bp, F3), jnp.float32),
        grid_spec=pltpu.PrefetchScalarGridSpec(
            num_scalar_prefetch=0,
            grid=(n_tiles,),
            in_specs=[
                pl.BlockSpec((tb, D_in), lambda i: (i, 0)),   # x batch tile
                full(wv_bf), full(bv),
                full(w1_bf), full(b1),
                full(w2_bf), full(b2),
                full(w3_bf), full(b3),
            ],
            out_specs=pl.BlockSpec((tb, F3), lambda i: (i, 0)),
        ),
        compiler_params=pltpu.CompilerParams(
            dimension_semantics=("parallel",),
            vmem_limit_bytes=vmem_limit),
        cost_estimate=pl.CostEstimate(
            flops=flops, transcendentals=0, bytes_accessed=bytes_accessed),
    )(xp, wv_bf, bv, w1_bf, b1, w2_bf, b2, w3_bf, b3)
    return out[:B]


def reference(x, wq, bq, wk, bk, wv, bv, w1, b1, w2, b2, w3, b3):
    """Pure-f32 JAX mirror of AttentionMLP.forward (eval mode), full softmax path."""
    B, D = x.shape
    xs = x.reshape(B, 1, D)
    q = xs @ wq + bq
    k = xs @ wk + bk
    v = xs @ wv + bv
    scores = (q @ jnp.swapaxes(k, -2, -1)) / (k.shape[-1] ** 0.5)
    w = jax.nn.softmax(scores, axis=-1)
    attn = (w @ v).reshape(B, -1)
    h = jax.nn.relu(attn @ w1 + b1)
    h = jax.nn.relu(h @ w2 + b2)          # dropout is identity at inference
    return h @ w3 + b3


if __name__ == "__main__":
    # Small shapes consistent with the module: attention_dim=64, hidden_dim=128,
    # fc2 -> 64, fc3 -> 2; pick input_dim=32, batch=8.
    B, D_in, A, H, F2, F3 = 8, 32, 64, 128, 64, 2

    key = jax.random.PRNGKey(0)
    ks = jax.random.split(key, 13)

    def init_w(k, fan_in, shape):
        bound = 1.0 / (fan_in ** 0.5)
        return jax.random.uniform(k, shape, jnp.float32, -bound, bound)

    x = jax.random.normal(ks[0], (B, D_in), dtype=jnp.float32)

    wq, bq = init_w(ks[1], D_in, (D_in, A)), init_w(ks[2], D_in, (1, A))
    wk, bk = init_w(ks[3], D_in, (D_in, A)), init_w(ks[4], D_in, (1, A))
    wv, bv = init_w(ks[5], D_in, (D_in, A)), init_w(ks[6], D_in, (1, A))
    w1, b1 = init_w(ks[7], A, (A, H)), init_w(ks[8], A, (1, H))
    w2, b2 = init_w(ks[9], H, (H, F2)), init_w(ks[10], H, (1, F2))
    w3, b3 = init_w(ks[11], F2, (F2, F3)), init_w(ks[12], F2, (1, F3))

    out = attention_mlp(x, wq, bq, wk, bk, wv, bv, w1, b1, w2, b2, w3, b3)
    out = jax.block_until_ready(out)

    ref = reference(x, wq, bq, wk, bk, wv, bv, w1, b1, w2, b2, w3, b3)
    assert out.shape == (B, F3)
    # bf16 MXU operands (f32 accumulation); the approx-reciprocal error source
    # from the previous version is gone, so the tolerance is tightened.
    assert jnp.allclose(out, ref, atol=2e-2, rtol=2e-2), "mismatch vs reference"

    print("KERNEL_OK")
</pallas_src>

<mosaic_0001>
module attributes {stable_mosaic.version = 11 : i64} {
  func.func @attention_mlp_kernel(%arg0: i32, %arg1: memref<8x32xf32, #tpu.memory_space<vmem>>, %arg2: memref<32x64xbf16, #tpu.memory_space<vmem>>, %arg3: memref<1x64xf32, #tpu.memory_space<vmem>>, %arg4: memref<64x128xbf16, #tpu.memory_space<vmem>>, %arg5: memref<1x128xf32, #tpu.memory_space<vmem>>, %arg6: memref<128x64xbf16, #tpu.memory_space<vmem>>, %arg7: memref<1x64xf32, #tpu.memory_space<vmem>>, %arg8: memref<64x2xbf16, #tpu.memory_space<vmem>>, %arg9: memref<1x2xf32, #tpu.memory_space<vmem>>, %arg10: memref<8x2xf32, #tpu.memory_space<vmem>>) attributes {dimension_semantics = [#tpu.dimension_semantics<parallel>], iteration_bounds = array<i64: 1>, scalar_prefetch = 0 : i64, scratch_operands = 0 : i64, tpu.core_type = #tpu.core_type<tc>, window_params = [{transform_indices = @transform_0, window_bounds = array<i64: 8, 32>}, {pipeline_mode = #tpu.pipeline_mode<synchronous>, transform_indices = @transform_1, window_bounds = array<i64: 32, 64>}, {pipeline_mode = #tpu.pipeline_mode<synchronous>, transform_indices = @transform_2, window_bounds = array<i64: 1, 64>}, {pipeline_mode = #tpu.pipeline_mode<synchronous>, transform_indices = @transform_3, window_bounds = array<i64: 64, 128>}, {pipeline_mode = #tpu.pipeline_mode<synchronous>, transform_indices = @transform_4, window_bounds = array<i64: 1, 128>}, {pipeline_mode = #tpu.pipeline_mode<synchronous>, transform_indices = @transform_5, window_bounds = array<i64: 128, 64>}, {pipeline_mode = #tpu.pipeline_mode<synchronous>, transform_indices = @transform_6, window_bounds = array<i64: 1, 64>}, {pipeline_mode = #tpu.pipeline_mode<synchronous>, transform_indices = @transform_7, window_bounds = array<i64: 64, 2>}, {pipeline_mode = #tpu.pipeline_mode<synchronous>, transform_indices = @transform_8, window_bounds = array<i64: 1, 2>}, {transform_indices = @transform_9, window_bounds = array<i64: 8, 2>}]} {
    %c0 = arith.constant 0 : index
    %c0_0 = arith.constant 0 : index
    %0 = vector.load %arg1[%c0, %c0_0] : memref<8x32xf32, #tpu.memory_space<vmem>>, vector<8x32xf32>
    %1 = arith.truncf %0 : vector<8x32xf32> to vector<8x32xbf16>
    %c0_1 = arith.constant 0 : index
    %c0_2 = arith.constant 0 : index
    %2 = vector.load %arg2[%c0_1, %c0_2] : memref<32x64xbf16, #tpu.memory_space<vmem>>, vector<32x64xbf16>
    %cst = arith.constant dense<0.000000e+00> : vector<8x64xf32>
    %3 = tpu.matmul %1, %2, %cst {dimension_numbers = #tpu.dot_dimension_numbers<[1], [0], [0], [1], [0, 0, 1, 1], [], []>} : vector<8x32xbf16>, vector<32x64xbf16>, vector<8x64xf32> -> vector<8x64xf32>
    %c0_3 = arith.constant 0 : index
    %c0_4 = arith.constant 0 : index
    %4 = vector.load %arg3[%c0_3, %c0_4] : memref<1x64xf32, #tpu.memory_space<vmem>>, vector<1x64xf32>
    %5 = vector.broadcast %4 : vector<1x64xf32> to vector<8x64xf32>
    %6 = arith.addf %3, %5 : vector<8x64xf32>
    %7 = arith.truncf %6 : vector<8x64xf32> to vector<8x64xbf16>
    %c0_5 = arith.constant 0 : index
    %c0_6 = arith.constant 0 : index
    %8 = vector.load %arg4[%c0_5, %c0_6] : memref<64x128xbf16, #tpu.memory_space<vmem>>, vector<64x128xbf16>
    %cst_7 = arith.constant dense<0.000000e+00> : vector<8x128xf32>
    %9 = tpu.matmul %7, %8, %cst_7 {dimension_numbers = #tpu.dot_dimension_numbers<[1], [0], [0], [1], [0, 0, 1, 1], [], []>} : vector<8x64xbf16>, vector<64x128xbf16>, vector<8x128xf32> -> vector<8x128xf32>
    %c0_8 = arith.constant 0 : index
    %c0_9 = arith.constant 0 : index
    %10 = vector.load %arg5[%c0_8, %c0_9] : memref<1x128xf32, #tpu.memory_space<vmem>>, vector<1x128xf32>
    %11 = vector.broadcast %10 : vector<1x128xf32> to vector<8x128xf32>
    %12 = arith.addf %9, %11 : vector<8x128xf32>
    %cst_10 = arith.constant 0.000000e+00 : f32
    %13 = vector.broadcast %cst_10 : f32 to vector<8x128xf32>
    %14 = arith.maximumf %12, %13 : vector<8x128xf32>
    %15 = arith.truncf %14 : vector<8x128xf32> to vector<8x128xbf16>
    %c0_11 = arith.constant 0 : index
    %c0_12 = arith.constant 0 : index
    %16 = vector.load %arg6[%c0_11, %c0_12] : memref<128x64xbf16, #tpu.memory_space<vmem>>, vector<128x64xbf16>
    %cst_13 = arith.constant dense<0.000000e+00> : vector<8x64xf32>
    %17 = tpu.matmul %15, %16, %cst_13 {dimension_numbers = #tpu.dot_dimension_numbers<[1], [0], [0], [1], [0, 0, 1, 1], [], []>} : vector<8x128xbf16>, vector<128x64xbf16>, vector<8x64xf32> -> vector<8x64xf32>
    %c0_14 = arith.constant 0 : index
    %c0_15 = arith.constant 0 : index
    %18 = vector.load %arg7[%c0_14, %c0_15] : memref<1x64xf32, #tpu.memory_space<vmem>>, vector<1x64xf32>
    %19 = vector.broadcast %18 : vector<1x64xf32> to vector<8x64xf32>
    %20 = arith.addf %17, %19 : vector<8x64xf32>
    %cst_16 = arith.constant 0.000000e+00 : f32
    %21 = vector.broadcast %cst_16 : f32 to vector<8x64xf32>
    %22 = arith.maximumf %20, %21 : vector<8x64xf32>
    %23 = arith.truncf %22 : vector<8x64xf32> to vector<8x64xbf16>
    %c0_17 = arith.constant 0 : index
    %c0_18 = arith.constant 0 : index
    %24 = vector.load %arg8[%c0_17, %c0_18] : memref<64x2xbf16, #tpu.memory_space<vmem>>, vector<64x2xbf16>
    %cst_19 = arith.constant dense<0.000000e+00> : vector<8x2xf32>
    %25 = tpu.matmul %23, %24, %cst_19 {dimension_numbers = #tpu.dot_dimension_numbers<[1], [0], [0], [1], [0, 0, 1, 1], [], []>} : vector<8x64xbf16>, vector<64x2xbf16>, vector<8x2xf32> -> vector<8x2xf32>
    %c0_20 = arith.constant 0 : index
    %c0_21 = arith.constant 0 : index
    %26 = vector.load %arg9[%c0_20, %c0_21] : memref<1x2xf32, #tpu.memory_space<vmem>>, vector<1x2xf32>
    %27 = vector.broadcast %26 : vector<1x2xf32> to vector<8x2xf32>
    %28 = arith.addf %25, %27 : vector<8x2xf32>
    %c0_22 = arith.constant 0 : index
    %c0_23 = arith.constant 0 : index
    %29 = vector.load %arg10[%c0_22, %c0_23] : memref<8x2xf32, #tpu.memory_space<vmem>>, vector<8x2xf32>
    tpu.vector_store %arg10[%c0_22, %c0_23], %28 {strides = array<i32>} : memref<8x2xf32, #tpu.memory_space<vmem>>, vector<8x2xf32>,
    return
  }
  func.func @transform_0(%arg0: i32) -> (i32, i32) {
    %c0_i32 = arith.constant 0 : i32
    %c0_i32_0 = arith.constant 0 : i32
    return %arg0, %c0_i32 : i32, i32
  }
  func.func @transform_1(%arg0: i32) -> (i32, i32) {
    %c0_i32 = arith.constant 0 : i32
    %c0_i32_0 = arith.constant 0 : i32
    %c0_i32_1 = arith.constant 0 : i32
    return %c0_i32, %c0_i32_0 : i32, i32
  }
  func.func @transform_2(%arg0: i32) -> (i32, i32) {
    %c0_i32 = arith.constant 0 : i32
    %c0_i32_0 = arith.constant 0 : i32
    %c0_i32_1 = arith.constant 0 : i32
    return %c0_i32, %c0_i32_0 : i32, i32
  }
  func.func @transform_3(%arg0: i32) -> (i32, i32) {
    %c0_i32 = arith.constant 0 : i32
    %c0_i32_0 = arith.constant 0 : i32
    %c0_i32_1 = arith.constant 0 : i32
    return %c0_i32, %c0_i32_0 : i32, i32
  }
  func.func @transform_4(%arg0: i32) -> (i32, i32) {
    %c0_i32 = arith.constant 0 : i32
    %c0_i32_0 = arith.constant 0 : i32
    %c0_i32_1 = arith.constant 0 : i32
    return %c0_i32, %c0_i32_0 : i32, i32
  }
  func.func @transform_5(%arg0: i32) -> (i32, i32) {
    %c0_i32 = arith.constant 0 : i32
    %c0_i32_0 = arith.constant 0 : i32
    %c0_i32_1 = arith.constant 0 : i32
    return %c0_i32, %c0_i32_0 : i32, i32
  }
  func.func @transform_6(%arg0: i32) -> (i32, i32) {
    %c0_i32 = arith.constant 0 : i32
    %c0_i32_0 = arith.constant 0 : i32
    %c0_i32_1 = arith.constant 0 : i32
    return %c0_i32, %c0_i32_0 : i32, i32
  }
  func.func @transform_7(%arg0: i32) -> (i32, i32) {
    %c0_i32 = arith.constant 0 : i32
    %c0_i32_0 = arith.constant 0 : i32
    %c0_i32_1 = arith.constant 0 : i32
    return %c0_i32, %c0_i32_0 : i32, i32
  }
  func.func @transform_8(%arg0: i32) -> (i32, i32) {
    %c0_i32 = arith.constant 0 : i32
    %c0_i32_0 = arith.constant 0 : i32
    %c0_i32_1 = arith.constant 0 : i32
    return %c0_i32, %c0_i32_0 : i32, i32
  }
  func.func @transform_9(%arg0: i32) -> (i32, i32) {
    %c0_i32 = arith.constant 0 : i32
    %c0_i32_0 = arith.constant 0 : i32
    return %arg0, %c0_i32 : i32, i32
  }
}

</mosaic_0001>

<bundles_post_ra>
// kernel: tpu_custom_call.1
= control target key start
LH: loop header
LB: loop body
LE: loop exit
PB: predicated region body
PF: predicated region fallthrough
CT: control target
= control target key end

     0   :  { %v508_v0 = vmov 0.0   ;;  %vm509_vm0 = vmmov 0   ;;  %vm58_vm1 = vcmask 261120   ;;  %vm142_vm2 = vcmask 523264   ;;  %s660_s1 = inlined_call_operand.vmem [shape: bf16[32,64], index: 1, kind: input, shape index: {}]   ;;  %s661_s0 = inlined_call_operand.vmem [shape: f32[8,32], index: 0, kind: input, shape index: {}]   ;;  %s662_s3 = inlined_call_operand.vmem [shape: bf16[64,128], index: 3, kind: input, shape index: {}]   ;;  %s663_s5 = inlined_call_operand.vmem [shape: bf16[128,64], index: 5, kind: input, shape index: {}]   ;;  %s664_s2 = inlined_call_operand.vmem [shape: f32[1,64], index: 2, kind: input, shape index: {}]   ;;  %s665_s7 = inlined_call_operand.vmem [shape: bf16[64,2], index: 7, kind: input, shape index: {}]   ;;  %s666_s4 = inlined_call_operand.vmem [shape: f32[1,128], index: 4, kind: input, shape index: {}]   ;;  %s667_s6 = inlined_call_operand.vmem [shape: f32[1,64], index: 6, kind: input, shape index: {}]   ;;  %s668_s8 = inlined_call_operand.vmem [shape: f32[1,2], index: 8, kind: input, shape index: {}]   ;;  %s669_s9 = inlined_call_operand.vmem [shape: f32[8,2], index: 9, kind: output, shape index: {}]  }
   0x1   :  { %436 = vmatprep.subr.bf16.mxu0 %v508_v0  ;;  %v490_v1 = vld [vmem:[%s660_s1] sm:$0xff]   ;;  %440 = vmatprep.mubr.msk.bf16.mxu0 %vm509_vm0, %v508_v0  ;;  %v491_v2 = vld [vmem:[%s660_s1 + $0x8] sm:$0xff]   ;;  %v494_v7 = vld [vmem:[%s662_s3 + $0x10] sm:$0xff]   ;;  %vm383_vm3 = vcmask 15360  }
   0x2   :  { %444 = vmatprep.subr.bf16.mxu1 %v508_v0  ;;  %452 = vmatprep.mubr.msk.bf16.mxu1 %vm509_vm0, %v508_v0  ;;  %v33_v3 = vld [vmem:[%s661_s0] sm:$0xff]  ;;  %v493_v6 = vld [vmem:[%s662_s3 + $0x8] sm:$0xff]   ;;  %v495_v8 = vld [vmem:[%s662_s3 + $0x18] sm:$0xff]  }
   0x3   :  { %437 = vmatpush3.bf16.msra.mxu0 %v490_v1  ;;  %v492_v4 = vld [vmem:[%s662_s3] sm:$0xff]   ;;  %v34_v5 = vpack.c.bf16 %v33_v3, %v33_v3  ;;  %v497_v10 = vld [vmem:[%s663_s5 + $0x8] sm:$0xff]   ;;  %v498_v11 = vld [vmem:[%s663_s5 + $0x10] sm:$0xff]  }
   0x4   :  { %438 = vmatprep.subr.bf16.mxu0 %v508_v0  ;;  %445 = vmatpush3.bf16.msra.mxu1 %v492_v4  ;;  %v496_v9 = vld [vmem:[%s663_s5] sm:$0xff]   ;;  %v499_v12 = vld [vmem:[%s663_s5 + $0x18] sm:$0xff]   ;;  %v501_v14 = vld [vmem:[%s663_s5 + $0x28] sm:$0xff]  }
   0x5   :  { %446 = vmatprep.subr.bf16.mxu1 %v508_v0  ;;  %v500_v13 = vld [vmem:[%s663_s5 + $0x20] sm:$0xff]   ;;  %v502_v22 = vld [vmem:[%s663_s5 + $0x30] sm:$0xff]   ;;  %v503_v23 = vld [vmem:[%s663_s5 + $0x38] sm:$0xff]  }
   0x6   :  { %v389_v15 = vld [vmem:[%s664_s2] ss:$0 sm:$0xff]  ;;  %v505_v25 = vld [vmem:[%s665_s7 + $0x8] sm:$0xff]   ;;  %v506_v34 = vld [vmem:[%s665_s7 + $0x10] sm:$0xff]  }
   0x7   :  { %439 = vmatpush3.bf16.msra.mxu0 %v491_v2  ;;  %v504_v24 = vld [vmem:[%s665_s7] sm:$0xff]   ;;  %v507_v35 = vld [vmem:[%s665_s7 + $0x18] sm:$0xff]  }
   0x8   :  { %456 = vmatprep.subr.bf16.mxu0 %v508_v0  ;;  %447 = vmatpush3.bf16.msra.mxu1 %v493_v6  ;;  %v393_v26 = vld [vmem:[%s666_s4] ss:$0 sm:$0xff] }
   0x9   :  { %448 = vmatprep.subr.bf16.mxu1 %v508_v0  ;;  %v399_v36 = vld [vmem:[%s667_s6] ss:$0 sm:$0xff] }
   0xa   :  { %441 = vmatmul.mubr.msk.bf16.vlgmr.msra.gmra.mrb[0].mxu0 %vm58_vm1, %v34_v5  ;;  %v408_v44 = vld [vmem:[%s668_s8] ss:$0 sm:$0xff] }
   0xb   :  { %472 = vmatprep.mubr.msk.bf16.mxu0 %vm509_vm0, %v508_v0  ;;  %457 = vmatpush3.bf16.msra.mxu0 %v496_v9 }
   0xc   :  { %449 = vmatpush3.bf16.msra.mxu1 %v494_v7  ;;  %458 = vmatprep.subr.bf16.mxu0 %v508_v0 }
   0xd   :  { %450 = vmatprep.subr.bf16.mxu1 %v508_v0 }
   0xf   :  { %459 = vmatpush3.bf16.msra.mxu0 %v497_v10 }
  0x10   :  { %451 = vmatpush3.bf16.msra.mxu1 %v495_v8  ;;  %460 = vmatprep.subr.bf16.mxu0 %v508_v0 }
  0x11   :  { %476 = vmatprep.subr.bf16.mxu1 %v508_v0 }
  0x13   :  { %461 = vmatpush3.bf16.msra.mxu0 %v498_v11 }
  0x14   :  { %462 = vmatprep.subr.bf16.mxu0 %v508_v0 }
  0x17   :  { %463 = vmatpush3.bf16.msra.mxu0 %v499_v12 }
  0x18   :  { %464 = vmatprep.subr.bf16.mxu0 %v508_v0 }
  0x1b   :  { %465 = vmatpush3.bf16.msra.mxu0 %v500_v13 }
  0x1c   :  { %466 = vmatprep.subr.bf16.mxu0 %v508_v0 }
  0x1f   :  { %467 = vmatpush3.bf16.msra.mxu0 %v501_v14 }
  0x20   :  { %468 = vmatprep.subr.bf16.mxu0 %v508_v0 }
  0x23   :  { %469 = vmatpush3.bf16.msra.mxu0 %v502_v22 }
  0x24   :  { %470 = vmatprep.subr.bf16.mxu0 %v508_v0 }
  0x27   :  { %471 = vmatpush3.bf16.msra.mxu0 %v503_v23 }
  0xdd   :  { %v96_v16 = vpop.f32.mrb[0].mxu0 }
  0xde   :  { %v97_v17 = vadd.f32 %v389_v15, %v96_v16  ;;  %v442_v18 = vpop.f32.mrb[1].mxu0 }
  0xdf   :  { %v99_v19 = vpop.f32.mrb[2].mxu0 }
  0xe0   :  { %v102_v20 = vpack.c.bf16 %v97_v17, %v97_v17  ;;  %v443_v21 = vpop.f32.mrb[3].mxu0 }
  0xe2   :  { %453 = vmatmul.mubr.msk.bf16.vlgmr.msra.gmra.mrb[0].mxu1 %vm142_vm2, %v102_v20 }
  0xe3   :  { %484 = vmatprep.mubr.msk.bf16.mxu1 %vm509_vm0, %v508_v0  ;;  %477 = vmatpush3.bf16.msra.mxu1 %v504_v24 }
  0xe4   :  { %478 = vmatprep.subr.bf16.mxu1 %v508_v0 }
  0xe7   :  { %479 = vmatpush3.bf16.msra.mxu1 %v505_v25 }
  0xe8   :  { %480 = vmatprep.subr.bf16.mxu1 %v508_v0 }
  0xeb   :  { %481 = vmatpush3.bf16.msra.mxu1 %v506_v34 }
  0xec   :  { %482 = vmatprep.subr.bf16.mxu1 %v508_v0 }
  0xef   :  { %483 = vmatpush3.bf16.msra.mxu1 %v507_v35 }
 0x1b5   :  { %v180_v27 = vpop.f32.mrb[0].mxu1 }
 0x1b6   :  { %v181_v28 = vadd.f32 %v393_v26, %v180_v27  ;;  %v454_v29 = vpop.f32.mrb[1].mxu1 }
 0x1b7   :  { %v183_v30 = vpop.f32.mrb[2].mxu1 }
 0x1b8   :  { %v186_v31 = vmax.f32 %v181_v28, 0.0  ;;  %v455_v32 = vpop.f32.mrb[3].mxu1 }
 0x1ba   :  { %v187_v33 = vpack.c.bf16 %v186_v31, %v186_v31 }
 0x1bc   :  { %473 = vmatmul.mubr.bf16.vlgmr.msra.gmra.mrb[4].mxu0 %v187_v33 }
 0x28f   :  { %v293_v37 = vpop.f32.mrb[4].mxu0 }
 0x290   :  { %v294_v38 = vadd.f32 %v399_v36, %v293_v37  ;;  %v474_v39 = vpop.f32.mrb[5].mxu0 }
 0x291   :  { %v296_v40 = vpop.f32.mrb[6].mxu0 }
 0x292   :  { %v299_v41 = vmax.f32 %v294_v38, 0.0  ;;  %v475_v42 = vpop.f32.mrb[7].mxu0 }
 0x294   :  { %v300_v43 = vpack.c.bf16 %v299_v41, %v299_v41 }
 0x296   :  { %485 = vmatmul.mubr.msk.bf16.vlgmr.msra.gmra.mrb[4].mxu1 %vm142_vm2, %v300_v43 }
 0x369   :  { %v377_v45 = vpop.f32.mrb[4].mxu1 }
 0x36a   :  { %v378_v46 = vadd.f32 %v408_v44, %v377_v45  ;;  %v486_v47 = vpop.f32.mrb[5].mxu1 }
 0x36b   :  { %v380_v48 = vpop.f32.mrb[6].mxu1 }
 0x36c   :  { %384 = vst.msk [vmem:[%s669_s9] sm:$0xff] %vm383_vm3, %v378_v46  ;;  %v487_v49 = vpop.f32.mrb[7].mxu1 }

</bundles_post_ra>
